<compile_context>
chip_gen: v5e
topology: v5e:2x2
jax: 0.10.0
libtpu: 0.0.40
codegen_flags: <defaults>
</compile_context>

<pallas_src>
import jax
import jax.numpy as jnp
from jax.experimental import pallas as pl
from jax.experimental.pallas import tpu as pltpu

STATE_DIM = 4    # CartPole-v1 observation dim
ACTION_DIM = 2   # CartPole-v1 action dim
HIDDEN = 24


def dqn_kernel(x_ref, w1_ref, b1_ref, w2_ref, b2_ref, w3_ref, b3_ref, o_ref):
    # Feature-major fused MLP; every operand already resident in VMEM.
    #   x_ref : [STATE_DIM, tb]            (batch tile on lanes)
    #   w1    : [HIDDEN, STATE_DIM]   b1 : [HIDDEN, 1]
    #   w2    : [HIDDEN, HIDDEN]      b2 : [HIDDEN, 1]
    #   w3    : [ACTION_DIM, HIDDEN]  b3 : [ACTION_DIM, 1]
    #   o_ref : [ACTION_DIM, tb]
    xT = x_ref[...]
    h1 = jnp.dot(w1_ref[...], xT, preferred_element_type=jnp.float32) + b1_ref[...]
    h1 = jnp.maximum(h1, 0.0)
    h2 = jnp.dot(w2_ref[...], h1, preferred_element_type=jnp.float32) + b2_ref[...]
    h2 = jnp.maximum(h2, 0.0)
    o_ref[...] = (jnp.dot(w3_ref[...], h2, preferred_element_type=jnp.float32)
                  + b3_ref[...]).astype(o_ref.dtype)


def _round_up(n, m):
    return ((n + m - 1) // m) * m


def _choose_batch_tile(B, tb_max=2048):
    """Lane-dense batch tile (multiple of 128).

    Small/typical replay batches (<= 1024 rows padded) run as ONE grid step —
    per-step overhead dominates this tiny network, and VMEM use is only
    ~tb * (4 + 24 + 24 + 2) * 4B (< 0.5 MiB at tb=2048, double-buffered).
    Bigger batches are split into >= 2 equal "parallel" steps so v7x megacore
    can shard them across both TensorCores.
    """
    Bp = _round_up(B, 128)
    if Bp <= 1024:
        return Bp
    return min(tb_max, _round_up(pl.cdiv(Bp, 2), 128))


def dqn_forward(x, params, *, tb=None):
    """x: [B, STATE_DIM] float32. Returns [B, ACTION_DIM] float32."""
    w1, b1, w2, b2, w3, b3 = params
    B, S = x.shape
    assert S == STATE_DIM

    if tb is None:
        tb = _choose_batch_tile(B)
    else:
        tb = _round_up(tb, 128)
    Bp = _round_up(B, tb)
    grid = (Bp // tb,)

    # Layout plumbing: batch onto the lane (last) dimension, zero-pad to tile.
    xT = x.T                                      # [STATE_DIM, B]
    if Bp != B:
        xT = jnp.pad(xT, ((0, 0), (0, Bp - B)))   # padded columns sliced off below

    flops = 2 * Bp * (STATE_DIM * HIDDEN + HIDDEN * HIDDEN + HIDDEN * ACTION_DIM)
    bytes_accessed = 4 * (Bp * STATE_DIM + Bp * ACTION_DIM
                          + HIDDEN * STATE_DIM + HIDDEN
                          + HIDDEN * HIDDEN + HIDDEN
                          + ACTION_DIM * HIDDEN + ACTION_DIM)
    cost = pl.CostEstimate(flops=flops, transcendentals=0,
                           bytes_accessed=bytes_accessed)

    outT = pl.pallas_call(
        dqn_kernel,
        out_shape=jax.ShapeDtypeStruct((ACTION_DIM, Bp), jnp.float32),
        grid_spec=pltpu.PrefetchScalarGridSpec(
            num_scalar_prefetch=0,
            grid=grid,
            in_specs=[
                # Batch tile on lanes; weight/bias blocks are the full (tiny)
                # arrays with a constant index_map -> fetched once, kept in VMEM.
                pl.BlockSpec((STATE_DIM, tb), lambda i: (0, i)),
                pl.BlockSpec((HIDDEN, STATE_DIM), lambda i: (0, 0)),
                pl.BlockSpec((HIDDEN, 1), lambda i: (0, 0)),
                pl.BlockSpec((HIDDEN, HIDDEN), lambda i: (0, 0)),
                pl.BlockSpec((HIDDEN, 1), lambda i: (0, 0)),
                pl.BlockSpec((ACTION_DIM, HIDDEN), lambda i: (0, 0)),
                pl.BlockSpec((ACTION_DIM, 1), lambda i: (0, 0)),
            ],
            out_specs=pl.BlockSpec((ACTION_DIM, tb), lambda i: (0, i)),
        ),
        compiler_params=pltpu.CompilerParams(
            dimension_semantics=("parallel",)),
        cost_estimate=cost,
    )(xT, w1, b1, w2, b2, w3, b3)

    return outT[:, :B].T                           # back to [B, ACTION_DIM]


def init_params(key):
    """Init matching PyTorch nn.Linear defaults (U(-1/sqrt(fan_in), +...)),
    with native [out, in] weights and [out, 1] column biases for the
    feature-major kernel."""
    def linear_init(k, fan_in, fan_out):
        kw, kb = jax.random.split(k)
        bound = 1.0 / (fan_in ** 0.5)
        w = jax.random.uniform(kw, (fan_out, fan_in), jnp.float32, -bound, bound)
        b = jax.random.uniform(kb, (fan_out, 1), jnp.float32, -bound, bound)
        return w, b

    k1, k2, k3 = jax.random.split(key, 3)
    w1, b1 = linear_init(k1, STATE_DIM, HIDDEN)
    w2, b2 = linear_init(k2, HIDDEN, HIDDEN)
    w3, b3 = linear_init(k3, HIDDEN, ACTION_DIM)
    return (w1, b1, w2, b2, w3, b3)


def dqn_reference(x, params):
    w1, b1, w2, b2, w3, b3 = params
    h1 = jnp.maximum(x @ w1.T + b1.T, 0.0)
    h2 = jnp.maximum(h1 @ w2.T + b2.T, 0.0)
    return h2 @ w3.T + b3.T


if __name__ == "__main__":
    key = jax.random.PRNGKey(0)
    kp, kx1, kx2 = jax.random.split(key, 3)
    params = init_params(kp)

    # Small-shape check: single grid step, batch padded 8 -> 128.
    x_small = jax.random.normal(kx1, (8, STATE_DIM), jnp.float32)
    out_small = jax.block_until_ready(dqn_forward(x_small, params))
    ref_small = dqn_reference(x_small, params)
    assert out_small.shape == (8, ACTION_DIM)
    assert jnp.allclose(out_small, ref_small, atol=1e-5, rtol=1e-5)

    # Multi-step grid + padding check (forced small tile to exercise the
    # parallel batch axis without needing a huge batch).
    x_med = jax.random.normal(kx2, (300, STATE_DIM), jnp.float32)
    out_med = jax.block_until_ready(dqn_forward(x_med, params, tb=128))
    ref_med = dqn_reference(x_med, params)
    assert out_med.shape == (300, ACTION_DIM)
    assert jnp.allclose(out_med, ref_med, atol=1e-5, rtol=1e-5)

    print("KERNEL_OK")
</pallas_src>

<mosaic_0001>
module attributes {stable_mosaic.version = 11 : i64} {
  func.func @dqn_kernel(%arg0: i32, %arg1: memref<4x128xf32, #tpu.memory_space<vmem>>, %arg2: memref<24x4xf32, #tpu.memory_space<vmem>>, %arg3: memref<24x1xf32, #tpu.memory_space<vmem>>, %arg4: memref<24x24xf32, #tpu.memory_space<vmem>>, %arg5: memref<24x1xf32, #tpu.memory_space<vmem>>, %arg6: memref<2x24xf32, #tpu.memory_space<vmem>>, %arg7: memref<2x1xf32, #tpu.memory_space<vmem>>, %arg8: memref<2x128xf32, #tpu.memory_space<vmem>>) attributes {dimension_semantics = [#tpu.dimension_semantics<parallel>], iteration_bounds = array<i64: 1>, scalar_prefetch = 0 : i64, scratch_operands = 0 : i64, tpu.core_type = #tpu.core_type<tc>, window_params = [{transform_indices = @transform_0, window_bounds = array<i64: 4, 128>}, {pipeline_mode = #tpu.pipeline_mode<synchronous>, transform_indices = @transform_1, window_bounds = array<i64: 24, 4>}, {pipeline_mode = #tpu.pipeline_mode<synchronous>, transform_indices = @transform_2, window_bounds = array<i64: 24, 1>}, {pipeline_mode = #tpu.pipeline_mode<synchronous>, transform_indices = @transform_3, window_bounds = array<i64: 24, 24>}, {pipeline_mode = #tpu.pipeline_mode<synchronous>, transform_indices = @transform_4, window_bounds = array<i64: 24, 1>}, {pipeline_mode = #tpu.pipeline_mode<synchronous>, transform_indices = @transform_5, window_bounds = array<i64: 2, 24>}, {pipeline_mode = #tpu.pipeline_mode<synchronous>, transform_indices = @transform_6, window_bounds = array<i64: 2, 1>}, {transform_indices = @transform_7, window_bounds = array<i64: 2, 128>}]} {
    %c0 = arith.constant 0 : index
    %c0_0 = arith.constant 0 : index
    %0 = vector.load %arg1[%c0, %c0_0] : memref<4x128xf32, #tpu.memory_space<vmem>>, vector<4x128xf32>
    %c0_1 = arith.constant 0 : index
    %c0_2 = arith.constant 0 : index
    %1 = vector.load %arg2[%c0_1, %c0_2] : memref<24x4xf32, #tpu.memory_space<vmem>>, vector<24x4xf32>
    %cst = arith.constant dense<0.000000e+00> : vector<24x128xf32>
    %2 = tpu.matmul %1, %0, %cst {dimension_numbers = #tpu.dot_dimension_numbers<[1], [0], [0], [1], [0, 0, 1, 1], [], []>} : vector<24x4xf32>, vector<4x128xf32>, vector<24x128xf32> -> vector<24x128xf32>
    %c0_3 = arith.constant 0 : index
    %c0_4 = arith.constant 0 : index
    %3 = vector.load %arg3[%c0_3, %c0_4] : memref<24x1xf32, #tpu.memory_space<vmem>>, vector<24x1xf32>
    %4 = vector.broadcast %3 : vector<24x1xf32> to vector<24x128xf32>
    %5 = arith.addf %2, %4 : vector<24x128xf32>
    %cst_5 = arith.constant 0.000000e+00 : f32
    %6 = vector.broadcast %cst_5 : f32 to vector<24x128xf32>
    %7 = arith.maximumf %5, %6 : vector<24x128xf32>
    %c0_6 = arith.constant 0 : index
    %c0_7 = arith.constant 0 : index
    %8 = vector.load %arg4[%c0_6, %c0_7] : memref<24x24xf32, #tpu.memory_space<vmem>>, vector<24x24xf32>
    %cst_8 = arith.constant dense<0.000000e+00> : vector<24x128xf32>
    %9 = tpu.matmul %8, %7, %cst_8 {dimension_numbers = #tpu.dot_dimension_numbers<[1], [0], [0], [1], [0, 0, 1, 1], [], []>} : vector<24x24xf32>, vector<24x128xf32>, vector<24x128xf32> -> vector<24x128xf32>
    %c0_9 = arith.constant 0 : index
    %c0_10 = arith.constant 0 : index
    %10 = vector.load %arg5[%c0_9, %c0_10] : memref<24x1xf32, #tpu.memory_space<vmem>>, vector<24x1xf32>
    %11 = vector.broadcast %10 : vector<24x1xf32> to vector<24x128xf32>
    %12 = arith.addf %9, %11 : vector<24x128xf32>
    %cst_11 = arith.constant 0.000000e+00 : f32
    %13 = vector.broadcast %cst_11 : f32 to vector<24x128xf32>
    %14 = arith.maximumf %12, %13 : vector<24x128xf32>
    %c0_12 = arith.constant 0 : index
    %c0_13 = arith.constant 0 : index
    %15 = vector.load %arg6[%c0_12, %c0_13] : memref<2x24xf32, #tpu.memory_space<vmem>>, vector<2x24xf32>
    %cst_14 = arith.constant dense<0.000000e+00> : vector<2x128xf32>
    %16 = tpu.matmul %15, %14, %cst_14 {dimension_numbers = #tpu.dot_dimension_numbers<[1], [0], [0], [1], [0, 0, 1, 1], [], []>} : vector<2x24xf32>, vector<24x128xf32>, vector<2x128xf32> -> vector<2x128xf32>
    %c0_15 = arith.constant 0 : index
    %c0_16 = arith.constant 0 : index
    %17 = vector.load %arg7[%c0_15, %c0_16] : memref<2x1xf32, #tpu.memory_space<vmem>>, vector<2x1xf32>
    %18 = vector.broadcast %17 : vector<2x1xf32> to vector<2x128xf32>
    %19 = arith.addf %16, %18 : vector<2x128xf32>
    %c0_17 = arith.constant 0 : index
    %c0_18 = arith.constant 0 : index
    %20 = vector.load %arg8[%c0_17, %c0_18] : memref<2x128xf32, #tpu.memory_space<vmem>>, vector<2x128xf32>
    tpu.vector_store %arg8[%c0_17, %c0_18], %19 {strides = array<i32>} : memref<2x128xf32, #tpu.memory_space<vmem>>, vector<2x128xf32>,
    return
  }
  func.func @transform_0(%arg0: i32) -> (i32, i32) {
    %c0_i32 = arith.constant 0 : i32
    %c0_i32_0 = arith.constant 0 : i32
    return %c0_i32, %arg0 : i32, i32
  }
  func.func @transform_1(%arg0: i32) -> (i32, i32) {
    %c0_i32 = arith.constant 0 : i32
    %c0_i32_0 = arith.constant 0 : i32
    %c0_i32_1 = arith.constant 0 : i32
    return %c0_i32, %c0_i32_0 : i32, i32
  }
  func.func @transform_2(%arg0: i32) -> (i32, i32) {
    %c0_i32 = arith.constant 0 : i32
    %c0_i32_0 = arith.constant 0 : i32
    %c0_i32_1 = arith.constant 0 : i32
    return %c0_i32, %c0_i32_0 : i32, i32
  }
  func.func @transform_3(%arg0: i32) -> (i32, i32) {
    %c0_i32 = arith.constant 0 : i32
    %c0_i32_0 = arith.constant 0 : i32
    %c0_i32_1 = arith.constant 0 : i32
    return %c0_i32, %c0_i32_0 : i32, i32
  }
  func.func @transform_4(%arg0: i32) -> (i32, i32) {
    %c0_i32 = arith.constant 0 : i32
    %c0_i32_0 = arith.constant 0 : i32
    %c0_i32_1 = arith.constant 0 : i32
    return %c0_i32, %c0_i32_0 : i32, i32
  }
  func.func @transform_5(%arg0: i32) -> (i32, i32) {
    %c0_i32 = arith.constant 0 : i32
    %c0_i32_0 = arith.constant 0 : i32
    %c0_i32_1 = arith.constant 0 : i32
    return %c0_i32, %c0_i32_0 : i32, i32
  }
  func.func @transform_6(%arg0: i32) -> (i32, i32) {
    %c0_i32 = arith.constant 0 : i32
    %c0_i32_0 = arith.constant 0 : i32
    %c0_i32_1 = arith.constant 0 : i32
    return %c0_i32, %c0_i32_0 : i32, i32
  }
  func.func @transform_7(%arg0: i32) -> (i32, i32) {
    %c0_i32 = arith.constant 0 : i32
    %c0_i32_0 = arith.constant 0 : i32
    return %c0_i32, %arg0 : i32, i32
  }
}

</mosaic_0001>

<bundles_post_ra>
// kernel: tpu_custom_call.1
= control target key start
LH: loop header
LB: loop body
LE: loop exit
PB: predicated region body
PF: predicated region fallthrough
CT: control target
= control target key end

     0   :  { %vm59_vm0 = vcmask 1043456   ;;  %v242_v3 = vmov 0   ;;  %vm49_vm1 = vcmask 31744   ;;  %s336_s0 = inlined_call_operand.vmem [shape: f32[4,128], index: 0, kind: input, shape index: {}]   ;;  %s337_s1 = inlined_call_operand.vmem [shape: f32[24,4], index: 1, kind: input, shape index: {}]   ;;  %s338_s2 = inlined_call_operand.vmem [shape: f32[24,1], index: 2, kind: input, shape index: {}]   ;;  %s339_s3 = inlined_call_operand.vmem [shape: f32[24,24], index: 3, kind: input, shape index: {}]   ;;  %s340_s4 = inlined_call_operand.vmem [shape: f32[24,1], index: 4, kind: input, shape index: {}]   ;;  %s341_s5 = inlined_call_operand.vmem [shape: f32[2,24], index: 5, kind: input, shape index: {}]   ;;  %s342_s6 = inlined_call_operand.vmem [shape: f32[2,1], index: 6, kind: input, shape index: {}]   ;;  %s343_s7 = inlined_call_operand.hbm [shape: f32[2,128], index: 7, kind: output, shape index: {}]  }
   0x1   :  { %v27_v0 = vld [vmem:[%s336_s0] sm:$0xf]  ;;  %v33_v1 = vld [vmem:[%s338_s2 + $0x10] sm:$0xff]  ;;  %213 = vset.pattern.permute.xlu0 %v242_v3 }
   0x2   :  { %v28_v2 = vld [vmem:[%s337_s1] sm:$0xff]  ;;  %199 = vmatpush.msk.msra.mxu0 %vm59_vm0, %v27_v0  ;;  %v30_v4 = vld [vmem:[%s337_s1 + $0x10] sm:$0xff]  ;;  %207 = vmatpush.msk.msra.mxu1 %vm59_vm0, %v27_v0 }
   0x3   :  { %46 = vperm.xlu0 %213, %v33_v1   ;;  %v31_v5 = vld [vmem:[%s338_s2] sm:$0xff]  ;;  %200 = vmatmul.msk.f32.vlgmr.msra.gmra.mxu0 %vm49_vm1, %v28_v2 }
   0x4   :  { %202 = vmatmul.msk.f32.vlgmr.msra.gmra.mxu1 %vm49_vm1, %v30_v4 }
   0x5   :  { %12 = vsyncpa [#allocation3], 0  ;;  %214 = vset.pattern.permute.xlu1 %v242_v3  ;;  %215 = vset.pattern.permute.xlu2 %v242_v3  ;;  %v32_v6 = vld [vmem:[%s338_s2 + $0x8] sm:$0xff]  ;;  %v97_v8 = vld [vmem:[%s340_s4 + $0x10] sm:$0xff]  ;;  %vm113_vm2 = vcmask 195584   ;;  %s190_s29 = sshll.u32 %s343_s7, 4  ;;  %s191_s29 = int_to_ptr.hbm [resolvable:$true] %s190_s29 }
   0x6   :  { %36 = vperm.xlu1 %214, %v31_v5   ;;  %v29_v7 = vld [vmem:[%s337_s1 + $0x8] sm:$0xff]  ;;  %v153_v9 = vld [vmem:[%s342_s6] sm:$0x3]  ;;  %v94_v26 = vld [vmem:[%s339_s3 + $0x10] sm:$0xff] }
   0x7   :  { %v96_v10 = vld [vmem:[%s340_s4 + $0x8] sm:$0xff]  ;;  %v95_v12 = vld [vmem:[%s340_s4] sm:$0xff] }
   0x8   :  { %105 = vperm.xlu2 %215, %v96_v10   ;;  %v93_v24 = vld [vmem:[%s339_s3 + $0x8] sm:$0xff]  ;;  %v92_v25 = vld [vmem:[%s339_s3] sm:$0xff]  ;;  %s243_s3 = smov [#allocation2]  }
   0x9   :  { %v152_v39 = vld [vmem:[%s341_s5] sm:$0x3]  ;;  %s188_s26 = sshll.u32 %s243_s3, 4  ;;  %s189_s26 = int_to_ptr.vmem [resolvable:$true] %s188_s26 }
   0xb   :  { %41 = vperm.xlu0 %213, %v32_v6   ;;  %201 = vmatmul.msk.f32.gmra.mxu0 %vm49_vm1, %v29_v7 }
   0xe   :  { %110 = vperm.xlu1 %214, %v97_v8  }
  0x10   :  { %100 = vperm.xlu2 %215, %v95_v12  }
  0x13   :  { %156 = vperm.xlu0 %213, %v153_v9  }
  0x62   :  { %v106_v27 = vpop.permute.xlu2 %105 }
  0x6a   :  { %v101_v30 = vpop.permute.xlu2 %100 }
  0x75   :  { %v47_v11 = vpop.permute.xlu0 %46 }
  0x78   :  { %v37_v17 = vpop.permute.xlu1 %36 }
  0x7d   :  { %v42_v18 = vpop.permute.xlu0 %41 }
  0x80   :  { %v80_v13 = vpop.f32.mrf.mxu0  ;;  %v111_v29 = vpop.permute.xlu1 %110 }
  0x81   :  { %v86_v14 = vpop.f32.mrf.mxu1  ;;  %v81_v20 = vadd.f32 %v80_v13, %v37_v17 }
  0x82   :  { %v87_v15 = vadd.f32 %v86_v14, %v47_v11 }
  0x83   :  { %v89_v23 = vmax.f32 %v81_v20, 0.0 }
  0x84   :  { %v91_v16 = vmax.f32 %v87_v15, 0.0 }
  0x85   :  { %v157_v40 = vpop.permute.xlu0 %156 }
  0x86   :  { %136 = vmatpush.msrb.mxu1 %v91_v16  ;;  %208 = vmatpush.msra.mxu3 %v91_v16 }
  0x88   :  { %v83_v19 = vpop.f32.mrf.mxu0 }
  0x89   :  { %v84_v21 = vadd.f32 %v83_v19, %v42_v18 }
  0x8b   :  { %v90_v22 = vmax.f32 %v84_v21, 0.0 }
  0x8d   :  { %137 = vmatpush.msrb.mxu1 %v90_v22  ;;  %209 = vmatpush.msra.mxu3 %v90_v22 }
  0x8f   :  { %138 = vmatpush.msrb.mxu1 %v89_v23  ;;  %210 = vmatpush.msra.mxu3 %v89_v23 }
  0x90   :  { %204 = vmatmul.msk.f32.vlgmr.msra.gmra.mxu3 %vm113_vm2, %v93_v24  ;;  %203 = vmatmul.msk.f32.vlgmr.msrb.gmra.mxu1 %vm113_vm2, %v92_v25 }
  0x98   :  { %205 = vmatmul.msk.f32.gmra.mxu3 %vm113_vm2, %v94_v26 }
 0x10d   :  { %v140_v31 = vpop.f32.mrf.mxu1 }
 0x10e   :  { %v141_v35 = vadd.f32 %v140_v31, %v101_v30 }
 0x110   :  { %v149_v38 = vmax.f32 %v141_v35, 0.0 }
 0x113   :  { %v143_v28 = vpop.f32.mrf.mxu3 }
 0x114   :  { %v144_v33 = vadd.f32 %v143_v28, %v106_v27 }
 0x116   :  { %v150_v37 = vmax.f32 %v144_v33, 0.0 }
 0x11b   :  { %v146_v32 = vpop.f32.mrf.mxu3 }
 0x11c   :  { %v147_v34 = vadd.f32 %v146_v32, %v111_v29 }
 0x11e   :  { %v151_v36 = vmax.f32 %v147_v34, 0.0 }
 0x120   :  { %175 = vmatpush.msra.mxu2 %v151_v36 }
 0x122   :  { %176 = vmatpush.msra.mxu2 %v150_v37 }
 0x124   :  { %177 = vmatpush.msra.mxu2 %v149_v38 }
 0x125   :  { %206 = vmatmul.msk.f32.vlgmr.msra.gmra.mxu2 %vm113_vm2, %v152_v39 }
 0x1a8   :  { %v179_v41 = vpop.f32.mrf.mxu2 }
 0x1a9   :  { %v180_v42 = vadd.f32 %v179_v41, %v157_v40 }
 0x1ab   :  { %182 = vst [vmem:[#allocation2] sm:$0x3] %v180_v42 }
 0x1ac   :  { %193 = dma.vmem_to_hbm [thread:$0]  %s189_s26, 32, %s191_s29, [#allocation3]  }
 0x1ad   :  { %240 = dma.done.wait [#allocation3], 32  }
 0x1ae   :  { %241 = vsyncadd [#allocation3], 4294967264 }
 0x1af   :  { %198 = vsyncpa [#allocation3], 1 }

</bundles_post_ra>
